<compile_context>
chip_gen: v6e
topology: v6e:2x2x1
jax: 0.10.0
libtpu: 0.0.40
codegen_flags: <defaults>
</compile_context>

<pallas_src>
import jax
import jax.numpy as jnp
from jax import lax
from jax.experimental import pallas as pl
from jax.experimental.pallas import tpu as pltpu


def cbow_kernel(ids_ref, emb_hbm, w1_ref, b1_ref, w2_ref, b2_ref,
                out_ref, emb_vmem, copy_sem):
    # ids_ref : (B_pad,) int32 in SMEM (scalar prefetch)
    # emb_hbm : (V, E) f32 raw HBM ref (gathered manually via DMA)
    # w1_ref  : (E, H) bf16, b1_ref: (1, H) f32
    # w2_ref  : (H, V) bf16, b2_ref: (1, V) f32
    # out_ref : (TILE_B, V) f32
    # emb_vmem: (TILE_B, E) f32 scratch, copy_sem: single DMA semaphore
    tile_b = out_ref.shape[0]
    base = pl.program_id(0) * tile_b

    # --- fused embedding gather: one row DMA per batch element of this tile ---
    def _issue(i, carry):
        row = ids_ref[base + i]
        pltpu.make_async_copy(
            emb_hbm.at[pl.ds(row, 1)],
            emb_vmem.at[pl.ds(i, 1)],
            copy_sem,
        ).start()
        return carry

    lax.fori_loop(0, tile_b, _issue, 0)

    def _wait(i, carry):
        # All row copies are identical in size and share one semaphore, so the
        # source index is a placeholder; the dst slice keeps the write effect
        # attached to the correct destination row.
        pltpu.make_async_copy(
            emb_hbm.at[pl.ds(0, 1)],
            emb_vmem.at[pl.ds(i, 1)],
            copy_sem,
        ).wait()
        return carry

    lax.fori_loop(0, tile_b, _wait, 0)

    x = emb_vmem[...]  # (TILE_B, E) f32

    # fc1 + ReLU  (bf16 MXU inputs, f32 accumulation)
    h = jnp.dot(x.astype(jnp.bfloat16), w1_ref[...],
                preferred_element_type=jnp.float32) + b1_ref[...]
    h = jnp.maximum(h, 0.0)

    # fc2
    logits = jnp.dot(h.astype(jnp.bfloat16), w2_ref[...],
                     preferred_element_type=jnp.float32) + b2_ref[...]

    # numerically stable softmax over the vocab (last) dim
    m = jnp.max(logits, axis=-1, keepdims=True)
    e = jnp.exp(logits - m)
    denom = jnp.sum(e, axis=-1, keepdims=True)
    out_ref[...] = e * pl.reciprocal(denom, approx=True)


def cbow_forward(token_ids, emb_table, w1, b1, w2, b2, *, tile_b=128):
    """token_ids: (B,) int32. Returns (B, V) f32 softmax probabilities."""
    B = token_ids.shape[0]
    V, E = emb_table.shape
    H = w1.shape[1]

    # Pad batch up to a multiple of tile_b (padded rows use token 0, sliced off).
    b_pad = pl.cdiv(B, tile_b) * tile_b
    ids = token_ids.astype(jnp.int32)
    if b_pad != B:
        ids = jnp.concatenate([ids, jnp.zeros((b_pad - B,), jnp.int32)])

    out = pl.pallas_call(
        cbow_kernel,
        out_shape=jax.ShapeDtypeStruct((b_pad, V), jnp.float32),
        grid_spec=pltpu.PrefetchScalarGridSpec(
            num_scalar_prefetch=1,                  # token ids -> SMEM
            grid=(b_pad // tile_b,),                # tiled over batch
            in_specs=[
                pl.BlockSpec(memory_space=pl.ANY),            # emb table stays in HBM
                pl.BlockSpec((E, H), lambda i, ids: (0, 0)),  # weights: VMEM-resident,
                pl.BlockSpec((1, H), lambda i, ids: (0, 0)),  # not re-DMA'd per tile
                pl.BlockSpec((H, V), lambda i, ids: (0, 0)),
                pl.BlockSpec((1, V), lambda i, ids: (0, 0)),
            ],
            out_specs=pl.BlockSpec((tile_b, V), lambda i, ids: (i, 0)),
            scratch_shapes=[
                pltpu.VMEM((tile_b, E), jnp.float32),
                pltpu.SemaphoreType.DMA,
            ],
        ),
        compiler_params=pltpu.CompilerParams(
            dimension_semantics=("parallel",),      # batch tiles split across TCs (v7x)
        ),
    )(ids, emb_table, w1, b1, w2, b2)
    return out[:B]


def cbow_reference(token_ids, emb_table, w1, b1, w2, b2):
    # Pure-JAX reference mirroring the kernel's precision choices.
    x = jnp.take(emb_table, token_ids, axis=0)
    h = jnp.maximum(
        jnp.dot(x.astype(jnp.bfloat16), w1, preferred_element_type=jnp.float32) + b1,
        0.0)
    logits = jnp.dot(h.astype(jnp.bfloat16), w2,
                     preferred_element_type=jnp.float32) + b2
    return jax.nn.softmax(logits, axis=-1)


if __name__ == "__main__":
    vocab_size = 256
    embedding_dim = 128
    hidden_dim = 128
    batch_size = 200  # intentionally not a multiple of TILE_B: exercises the padding path

    key = jax.random.PRNGKey(0)
    k_emb, k_w1, k_b1, k_w2, k_b2, k_x = jax.random.split(key, 6)

    emb_table = jax.random.normal(k_emb, (vocab_size, embedding_dim), jnp.float32) * 0.1
    # Linear weights stored (in_features, out_features) == W.T of PyTorch layout,
    # kept in bf16 per the performance review (f32 accumulation in the kernel).
    w1 = (jax.random.normal(k_w1, (embedding_dim, hidden_dim), jnp.float32) * 0.05
          ).astype(jnp.bfloat16)
    b1 = jax.random.normal(k_b1, (1, hidden_dim), jnp.float32) * 0.01
    w2 = (jax.random.normal(k_w2, (hidden_dim, vocab_size), jnp.float32) * 0.05
          ).astype(jnp.bfloat16)
    b2 = jax.random.normal(k_b2, (1, vocab_size), jnp.float32) * 0.01

    token_ids = jax.random.randint(k_x, (batch_size,), 0, vocab_size, jnp.int32)

    probs = cbow_forward(token_ids, emb_table, w1, b1, w2, b2, tile_b=128)
    probs = jax.block_until_ready(probs)

    ref = cbow_reference(token_ids, emb_table, w1, b1, w2, b2)

    assert probs.shape == (batch_size, vocab_size)
    row_sums = jnp.sum(probs, axis=-1)
    assert bool(jnp.all(jnp.abs(row_sums - 1.0) < 5e-3)), "softmax rows do not sum to 1"
    assert bool(jnp.max(jnp.abs(probs - ref)) < 2e-3), "mismatch vs pure-JAX reference"

    print("KERNEL_OK")
</pallas_src>

<mosaic_0001>
module attributes {stable_mosaic.version = 11 : i64} {
  func.func @cbow_kernel(%arg0: i32, %arg1: memref<256xi32, #tpu.memory_space<smem>>, %arg2: memref<256x128xf32, #tpu.memory_space<any>>, %arg3: memref<128x128xbf16, #tpu.memory_space<vmem>>, %arg4: memref<1x128xf32, #tpu.memory_space<vmem>>, %arg5: memref<128x256xbf16, #tpu.memory_space<vmem>>, %arg6: memref<1x256xf32, #tpu.memory_space<vmem>>, %arg7: memref<128x256xf32, #tpu.memory_space<vmem>>, %arg8: memref<128x128xf32, #tpu.memory_space<vmem>>, %arg9: memref<!tpu.dma_semaphore, #tpu.memory_space<semaphore_mem>>) attributes {dimension_semantics = [#tpu.dimension_semantics<parallel>], iteration_bounds = array<i64: 2>, scalar_prefetch = 1 : i64, scratch_operands = 2 : i64, tpu.core_type = #tpu.core_type<tc>, window_params = [{}, {pipeline_mode = #tpu.pipeline_mode<synchronous>, transform_indices = @transform_1, window_bounds = array<i64: 128, 128>}, {pipeline_mode = #tpu.pipeline_mode<synchronous>, transform_indices = @transform_2, window_bounds = array<i64: 1, 128>}, {pipeline_mode = #tpu.pipeline_mode<synchronous>, transform_indices = @transform_3, window_bounds = array<i64: 128, 256>}, {pipeline_mode = #tpu.pipeline_mode<synchronous>, transform_indices = @transform_4, window_bounds = array<i64: 1, 256>}, {transform_indices = @transform_5, window_bounds = array<i64: 128, 256>}]} {
    %c128_i32 = arith.constant 128 : i32
    %0 = arith.muli %arg0, %c128_i32 : i32
    %c0_i32 = arith.constant 0 : i32
    %c128_i32_0 = arith.constant 128 : i32
    %1 = arith.addi %c0_i32, %c128_i32_0 : i32
    %c1_i32 = arith.constant 1 : i32
    scf.for %arg10 = %c0_i32 to %1 step %c1_i32  : i32 {
      %29 = arith.addi %0, %arg10 : i32
      %30 = arith.index_cast %29 : i32 to index
      %31 = memref.load %arg1[%30] : memref<256xi32, #tpu.memory_space<smem>>
      %c0_i32_21 = arith.constant 0 : i32
      %32 = tpu.memref_slice %arg2[%31, %c0_i32_21] : memref<256x128xf32, #tpu.memory_space<any>> -> memref<1x128xf32, #tpu.memory_space<any>>
      %c0_i32_22 = arith.constant 0 : i32
      %33 = tpu.memref_slice %arg8[%arg10, %c0_i32_22] : memref<128x128xf32, #tpu.memory_space<vmem>> -> memref<1x128xf32, #tpu.memory_space<vmem>>
      tpu.enqueue_dma source(%32 : memref<1x128xf32, #tpu.memory_space<any>>) target(%33 : memref<1x128xf32, #tpu.memory_space<vmem>>) target_semaphore(%arg9 : memref<!tpu.dma_semaphore, #tpu.memory_space<semaphore_mem>>)
    }
    %c128_i32_1 = arith.constant 128 : i32
    %c0_i32_2 = arith.constant 0 : i32
    %c128_i32_3 = arith.constant 128 : i32
    %2 = arith.addi %c0_i32_2, %c128_i32_3 : i32
    %c1_i32_4 = arith.constant 1 : i32
    scf.for %arg10 = %c0_i32_2 to %2 step %c1_i32_4  : i32 {
      %c0_i32_21 = arith.constant 0 : i32
      %c0_i32_22 = arith.constant 0 : i32
      %29 = tpu.memref_slice %arg2[%c0_i32_21, %c0_i32_22] : memref<256x128xf32, #tpu.memory_space<any>> -> memref<1x128xf32, #tpu.memory_space<any>>
      %c0_i32_23 = arith.constant 0 : i32
      %30 = tpu.memref_slice %arg8[%arg10, %c0_i32_23] : memref<128x128xf32, #tpu.memory_space<vmem>> -> memref<1x128xf32, #tpu.memory_space<vmem>>
      tpu.wait_dma2 semaphore(%arg9 : memref<!tpu.dma_semaphore, #tpu.memory_space<semaphore_mem>>) src(%29 : memref<1x128xf32, #tpu.memory_space<any>>) dst(%30 : memref<1x128xf32, #tpu.memory_space<vmem>>)
    }
    %c128_i32_5 = arith.constant 128 : i32
    %c0 = arith.constant 0 : index
    %c0_6 = arith.constant 0 : index
    %3 = vector.load %arg8[%c0, %c0_6] : memref<128x128xf32, #tpu.memory_space<vmem>>, vector<128x128xf32>
    %4 = arith.truncf %3 : vector<128x128xf32> to vector<128x128xbf16>
    %c0_7 = arith.constant 0 : index
    %c0_8 = arith.constant 0 : index
    %5 = vector.load %arg3[%c0_7, %c0_8] : memref<128x128xbf16, #tpu.memory_space<vmem>>, vector<128x128xbf16>
    %cst = arith.constant dense<0.000000e+00> : vector<128x128xf32>
    %6 = tpu.matmul %4, %5, %cst {dimension_numbers = #tpu.dot_dimension_numbers<[1], [0], [0], [1], [0, 0, 1, 1], [], []>} : vector<128x128xbf16>, vector<128x128xbf16>, vector<128x128xf32> -> vector<128x128xf32>
    %c0_9 = arith.constant 0 : index
    %c0_10 = arith.constant 0 : index
    %7 = vector.load %arg4[%c0_9, %c0_10] : memref<1x128xf32, #tpu.memory_space<vmem>>, vector<1x128xf32>
    %8 = vector.broadcast %7 : vector<1x128xf32> to vector<128x128xf32>
    %9 = arith.addf %6, %8 : vector<128x128xf32>
    %cst_11 = arith.constant 0.000000e+00 : f32
    %10 = vector.broadcast %cst_11 : f32 to vector<128x128xf32>
    %11 = arith.maximumf %9, %10 : vector<128x128xf32>
    %12 = arith.truncf %11 : vector<128x128xf32> to vector<128x128xbf16>
    %c0_12 = arith.constant 0 : index
    %c0_13 = arith.constant 0 : index
    %13 = vector.load %arg5[%c0_12, %c0_13] : memref<128x256xbf16, #tpu.memory_space<vmem>>, vector<128x256xbf16>
    %cst_14 = arith.constant dense<0.000000e+00> : vector<128x256xf32>
    %14 = tpu.matmul %12, %13, %cst_14 {dimension_numbers = #tpu.dot_dimension_numbers<[1], [0], [0], [1], [0, 0, 1, 1], [], []>} : vector<128x128xbf16>, vector<128x256xbf16>, vector<128x256xf32> -> vector<128x256xf32>
    %c0_15 = arith.constant 0 : index
    %c0_16 = arith.constant 0 : index
    %15 = vector.load %arg6[%c0_15, %c0_16] : memref<1x256xf32, #tpu.memory_space<vmem>>, vector<1x256xf32>
    %16 = vector.broadcast %15 : vector<1x256xf32> to vector<128x256xf32>
    %17 = arith.addf %14, %16 : vector<128x256xf32>
    %cst_17 = arith.constant dense<0xFF800000> : vector<128xf32>
    %18 = vector.multi_reduction <maximumf>, %17, %cst_17 [1] : vector<128x256xf32> to vector<128xf32>
    %19 = vector.shape_cast %18 : vector<128xf32> to vector<128x1xf32>
    %20 = vector.broadcast %19 : vector<128x1xf32> to vector<128x256xf32>
    %21 = arith.subf %17, %20 : vector<128x256xf32>
    %22 = math.exp %21 : vector<128x256xf32>
    %cst_18 = arith.constant dense<0.000000e+00> : vector<128xf32>
    %23 = vector.multi_reduction <add>, %22, %cst_18 [1] : vector<128x256xf32> to vector<128xf32>
    %24 = vector.shape_cast %23 : vector<128xf32> to vector<128x1xf32>
    %25 = tpu.reciprocal %24 {approx = true} : vector<128x1xf32> -> vector<128x1xf32>
    %26 = vector.broadcast %25 : vector<128x1xf32> to vector<128x256xf32>
    %27 = arith.mulf %22, %26 : vector<128x256xf32>
    %c0_19 = arith.constant 0 : index
    %c0_20 = arith.constant 0 : index
    %28 = vector.load %arg7[%c0_19, %c0_20] : memref<128x256xf32, #tpu.memory_space<vmem>>, vector<128x256xf32>
    tpu.vector_store %arg7[%c0_19, %c0_20], %27 {strides = array<i32>} : memref<128x256xf32, #tpu.memory_space<vmem>>, vector<128x256xf32>,
    return
  }
  func.func @transform_1(%arg0: i32, %arg1: memref<256xi32, #tpu.memory_space<smem>>) -> (i32, i32) {
    %c0_i32 = arith.constant 0 : i32
    %c0_i32_0 = arith.constant 0 : i32
    %c0_i32_1 = arith.constant 0 : i32
    return %c0_i32, %c0_i32_0 : i32, i32
  }
  func.func @transform_2(%arg0: i32, %arg1: memref<256xi32, #tpu.memory_space<smem>>) -> (i32, i32) {
    %c0_i32 = arith.constant 0 : i32
    %c0_i32_0 = arith.constant 0 : i32
    %c0_i32_1 = arith.constant 0 : i32
    return %c0_i32, %c0_i32_0 : i32, i32
  }
  func.func @transform_3(%arg0: i32, %arg1: memref<256xi32, #tpu.memory_space<smem>>) -> (i32, i32) {
    %c0_i32 = arith.constant 0 : i32
    %c0_i32_0 = arith.constant 0 : i32
    %c0_i32_1 = arith.constant 0 : i32
    return %c0_i32, %c0_i32_0 : i32, i32
  }
  func.func @transform_4(%arg0: i32, %arg1: memref<256xi32, #tpu.memory_space<smem>>) -> (i32, i32) {
    %c0_i32 = arith.constant 0 : i32
    %c0_i32_0 = arith.constant 0 : i32
    %c0_i32_1 = arith.constant 0 : i32
    return %c0_i32, %c0_i32_0 : i32, i32
  }
  func.func @transform_5(%arg0: i32, %arg1: memref<256xi32, #tpu.memory_space<smem>>) -> (i32, i32) {
    %c0_i32 = arith.constant 0 : i32
    %c0_i32_0 = arith.constant 0 : i32
    return %arg0, %c0_i32 : i32, i32
  }
}

</mosaic_0001>

<bundles_post_ra>
// kernel: tpu_custom_call.1
= control target key start
LH: loop header
LB: loop body
LE: loop exit
PB: predicated region body
PF: predicated region fallthrough
CT: control target
= control target key end

     0   :  { %s1553_s21 = smov [#allocation5]   ;;  %s2108_s0 = inlined_call_operand.hbm [shape: s32[256], index: 0, kind: input, shape index: {}]   ;;  %s2109_s1 = inlined_call_operand.hbm [shape: f32[256,128], index: 1, kind: input, shape index: {}]   ;;  %s2110_s2 = inlined_call_operand.hbm [shape: bf16[128,128], index: 2, kind: input, shape index: {}]   ;;  %s2111_s3 = inlined_call_operand.vmem [shape: f32[1,128], index: 3, kind: input, shape index: {}]   ;;  %s2112_s4 = inlined_call_operand.hbm [shape: bf16[128,256], index: 4, kind: input, shape index: {}]   ;;  %s2113_s5 = inlined_call_operand.vmem [shape: f32[1,256], index: 5, kind: input, shape index: {}]   ;;  %s2114_s6 = inlined_call_operand.hbm [shape: f32[256,256], index: 6, kind: output, shape index: {}]  }
   0x1   :  { %2117 = sst [smem:[#allocation21_spill]] %s2110_s2 }
   0x2   :  { %12 = dma.hbm_to_smem %s2108_s0, 32, %s1553_s21, [#allocation4] }
   0x3   :  { %1513 = dma.done.wait [#allocation4], 32 }
   0x4   :  { %1514 = vsyncadd [#allocation4], 4294967264 }
   0x5   :  { %14 = sfence }
   0x6   :  { %15 = vsyncpa [#allocation7], 0 }
   0x7   :  { %16 = vsyncpa [#allocation10], 0 }
   0x8   :  { %17 = vsyncpa [#allocation8], 0 }
   0x9   :  { %19 = vsyncpa [#allocation8 + $0x1], 0  ;;  %s1603_s24 = smov 0   ;;  %s1605_s25 = smov 0  }
   0xa   :  { %s1607_s26 = smov 0   ;;  %s1609_s27 = smov 0  }
   0xb LB: > { %s1624_s0 = sadd.s32 4294967295, %s1543_s27   ;;  %s1061_s28 = sadd.s32 4294967294, %s1543_s27   ;;  %s1543_s27 = sphi %s1609_s27, %s2132_s27   ;;  %s1539_s26 = sphi %s1607_s26, %s2131_s26   ;;  %s1535_s25 = sphi %s1605_s25, %s2130_s25   ;;  %s1531_s24 = sphi %s1603_s24, %s2129_s24  }
   0xc   : > { %s1628_s29 = sadd.s32 1, %s1543_s27   ;;  %s116_s30 = sadd.s32 1, %s1539_s26 }
   0xd   : > { %s113_s7 = ssub.s32 %s1543_s27, %s1628_s29  ;;  %p126_p0 = scmp.ne.s32.totalorder %s1539_s26, %s1535_s25 }
   0xe   : > { %p114_p1 = scmp.eq.s32.totalorder %s113_s7, 0  ;;  %p127_p2 = scmp.eq.s32.totalorder %s1624_s0, 1 }
   0xf   : > { %p132_p3 = scmp.ne.s32.totalorder %s1535_s25, %s1531_s24  ;;  %p133_p4 = scmp.eq.s32.totalorder %s1061_s28, 1 }
  0x10   : > { %s1639_s8 = scalar_select %p114_p1, %s1539_s26, %s116_s30  }
  0x11   : > { %p1641_p5 = por %p127_p2, %p126_p0  ;;  %p1645_p6 = por %p133_p4, %p132_p3 }
  0x12   : > { %p1062_p7 = scmp.ge.s32.totalorder %s1543_s27, 1  ;;  %p140_p8 = scmp.lt.s32.totalorder %s1543_s27, 3 }
  0x13   : > { %s2119_s10 = scalar_select %p1645_p6, 1, 0 }
  0x14   : > { %p2115_p9 = scmp.eq.s32.totalorder %s1624_s0, 0  ;;  %p1652_p10 = pnand %p1062_p7, %p140_p8 }
  0x15   : > { %s1554_s12 = smov [#allocation6]   ;;  %s1555_s15 = smov [#allocation9]  }
  0x16   : > { %s152_s13 = sshll.u32 %s1554_s12, 4  ;;  %p1179_p11 = pneg %p1652_p10  ;;  %s153_s13 = int_to_ptr.vmem [resolvable:$true] %s152_s13 }
  0x17   : > { %s168_s16 = sshll.u32 %s1555_s15, 4  ;;  %s1400_s17 = scalar_lea.vmem %s153_s13, 1024  ;;  %s169_s16 = int_to_ptr.vmem [resolvable:$true] %s168_s16 }
  0x18   : > { %p1660_p12 = pnand %p2115_p9, %p1179_p11  ;;  %p1401_p0 = scmp.ne.s32.totalorder %s153_s13, %s1400_s17 }
  0x19   : > { %p1408_p3 = scmp.lt.s32.totalorder %s153_s13, %s153_s13  ;;  %p1409_p4 = scmp.lt.s32.totalorder %s1400_s17, %s1400_s17 }
  0x1a   : > { %p1391_p13 = pneg %p1660_p12 }
  0x1b   : > { %p1410_p7 = por %p1409_p4, %p1408_p3 }
  0x1c   : > { %p1403_p1 = pnand %p1401_p0, %p1391_p13 }
  0x1e   : > { %p1404_p2 = pneg %p1403_p1 }
  0x20   : > { %p1411_p8 = pnand %p1410_p7, %p1404_p2 }
  0x22   : > { %1414 = shalt.err (!%p1411_p8)
}
  0x23   : > { %s1556_s18 = smov 64   ;;  %s1557_s19 = smov 4  }
  0x24   : > { %s2122_s2 = sld [smem:[#allocation21_spill]]  ;;  %s1426_s22 = scalar_lea.vmem %s169_s16, 2048 }
  0x25   : > { %p1427_p11 = scmp.ne.s32.totalorder %s169_s16, %s1426_s22  ;;  %p1434_p9 = scmp.lt.s32.totalorder %s169_s16, %s169_s16 }
  0x26   : > { %p1435_p6 = scmp.lt.s32.totalorder %s1426_s22, %s1426_s22 }
  0x27   : > { %p1429_p0 = pnand %p1427_p11, %p1391_p13 }
  0x28   : > { %p1436_p3 = por %p1435_p6, %p1434_p9 }
  0x29   : > { %p1430_p1 = pneg %p1429_p0 }
  0x2a   : > { %1182 = dma.hbm_to_vmem [thread:$0]  (!%p1660_p12), %s2122_s2, 1024, %s153_s13, [#allocation7], %s1556_s18, %s1556_s18, %s1557_s19  }
  0x2b   : > { %p1437_p2 = pnand %p1436_p3, %p1430_p1 }
  0x2d   : > { %1440 = shalt.err (!%p1437_p2)
}
  0x2e   : > { %s1558_s23 = smov 128   ;;  %s1559_s28 = smov 8  }
  0x2f   : > { %1185 = dma.hbm_to_vmem [thread:$0]  (!%p1660_p12), %s2112_s4, 2048, %s169_s16, [#allocation10], %s1558_s23, %s1558_s23, %s1559_s28  }
  0x30   : > { %187 = sbr.rel (%p1652_p10) target bundleno = 915 (0x393), region = 36  ;;  %p2123_p4 = scmp.eq.s32.totalorder (!%p1652_p10), %s1624_s0, 0 }
  0x35   : > { %1516 = dma.done.wait (%p2123_p4), [#allocation7], 1024   ;;  %p2124_p13 = pmov %p2123_p4 }
  0x36   : > { %p2125_p6 = pmov %p2123_p4 }
  0x37   : > { %1518 = vsyncadd (%p2124_p13), [#allocation7], 4294966272 }
  0x38   : > { %1520 = dma.done.wait (%p2125_p6), [#allocation10], 2048   ;;  %p2126_p9 = pmov %p2123_p4 }
  0x39   : > { %s2116_s12 = sand.u32 1, %s1535_s25   ;;  %s1069_s13 = sshll.u32 %s1624_s0, 7 }
  0x3a   : > { %1522 = vsyncadd (%p2126_p9), [#allocation10], 4294965248  ;;  %s1068_s11 = sshll.u32 %s2116_s12, 8  ;;  %s1698_s15 = smov 0  }
  0x3b   : > { %s1696_s14 = scalar_lea.vmem [#allocation11], %s1068_s11 }
  0x3c LB: >> { %s221_s16 = sadd.s32 %s1547_s15, %s1069_s13  ;;  %s225_s18 = scalar_lea.vmem [#allocation2], %s1547_s15  ;;  %s1547_s15 = sphi %s1698_s15, %s220_s15  }
  0x3d   : >> { %s222_s17 = sld [smem:[#allocation5 + %s221_s16]]  ;;  %s233_s19 = sshll.u32 %s225_s18, 4  ;;  %s234_s19 = int_to_ptr.vmem [resolvable:$true] %s233_s19 }
  0x3e   : >> { %s1443_s11 = scalar_lea.hbm %s2109_s1, 4096 }
  0x43   : >> { %s1070_s20 = sshll.u32 %s222_s17, 4 }
  0x44   : >> { %s224_s23 = scalar_lea.hbm %s2109_s1, %s1070_s20 }
  0x45   : >> { %s1441_s28 = scalar_lea.hbm %s224_s23, 16  ;;  %p1444_p12 = scmp.lt.s32.totalorder %s224_s23, %s2109_s1 }
  0x46   : >> { %p1442_p10 = scmp.ne.s32.totalorder %s224_s23, %s1441_s28  ;;  %p1445_p7 = scmp.lt.s32.totalorder %s1443_s11, %s1441_s28 }
  0x48   : >> { %p1446_p8 = por %p1445_p7, %p1444_p12 }
  0x4a   : >> { %p1447_p11 = pnand %p1446_p8, %p1442_p10 }
  0x4c   : >> { %1450 = shalt.err (!%p1447_p11)  }
  0x4d   : >> { %s1451_s16 = scalar_lea.vmem %s234_s19, 16  ;;  %s1560_s17 = smov [#allocation2]  }
  0x4e   : >> { %p1452_p0 = scmp.ne.s32.totalorder %s234_s19, %s1451_s16  ;;  %s1453_s18 = sshll.u32 %s1560_s17, 4  ;;  %s1454_s18 = int_to_ptr.vmem [resolvable:$false] %s1453_s18 }
  0x4f   : >> { %s1455_s20 = scalar_lea.vmem %s1454_s18, 2048  ;;  %p1456_p1 = scmp.lt.s32.totalorder %s234_s19, %s1454_s18 }
  0x50   : >> { %p1457_p3 = scmp.lt.s32.totalorder %s1455_s20, %s1451_s16 }
  0x52   : >> { %p1458_p2 = por %p1457_p3, %p1456_p1 }
  0x54   : >> { %p1459_p4 = pnand %p1458_p2, %p1452_p0 }
  0x56   : >> { %1462 = shalt.err (!%p1459_p4)  }
  0x57   : >> { %236 = dma.hbm_to_vmem [thread:$0]  %s224_s23, 16, %s234_s19, [#allocation3] }
  0x58   : >> { %s220_s15 = sadd.s32 1, %s1547_s15  }
  0x59   : >> { %p217_p13 = scmp.ge.s32.totalorder %s220_s15, 128  }
  0x5a   : > { %s1549_s2 = smov (%p217_p13), 0  }
  0x5b   : > { %219 = sbr.rel (!%p217_p13) target bundleno = 60 (0x3c), region = 97 }
  0x60 LB: >> { %1523 = dma.done.wait [#allocation3], 16  ;;  %s1551_s2 = sphi %s1549_s2, %s242_s2  }
  0x61   : >> { %1524 = vsyncadd [#allocation3], 4294967280  ;;  %s242_s2 = sadd.s32 1, %s1551_s2  }
  0x62   : >> { %p239_p6 = scmp.ge.s32.totalorder %s242_s2, 128  }
  0x63   : > { %v1253_v0 = vld [vmem:[#allocation6 + $0x38] sm:$0xff] (%p239_p6)   ;;  %v1254_v1 = vld [vmem:[#allocation6 + $0x30] sm:$0xff] (%p239_p6)   ;;  %v1255_v2 = vld [vmem:[#allocation6 + $0x28] sm:$0xff] (%p239_p6)   ;;  %v1561_v48 = vmov (%p239_p6), 0   ;;  %s1104_s21 = sshll.u32 (%p239_p6), %s1624_s0, 12  ;;  %s970_s22 = sshll.u32 (%p239_p6), %s1696_s14, 4  ;;  %s2060_s22 = int_to_ptr.vmem [resolvable:$true] %s970_s22 }
  0x64   : > { %241 = sbr.rel (!%p239_p6) target bundleno = 96 (0x60), region = 108  ;;  %1121 = vmatprep.subr.bf16.mxu0 (%p239_p6), %v1253_v0  ;;  %v1256_v3 = vld [vmem:[#allocation6 + $0x20] sm:$0xff] (%p239_p6)   ;;  %v247_v5 = vld [vmem:[#allocation2 + $0x8] sm:$0xff] (%p239_p6)  ;;  %v1257_v7 = vld [vmem:[#allocation6 + $0x18] sm:$0xff] (%p239_p6)   ;;  %622 = vmatprep.mubr.bf16.mxu1 (%p239_p6), %v1561_v48  ;;  %s2058_s30 = scalar_lea.hbm (%p239_p6), %s2114_s6, %s1104_s21 }
  0x65   : > { %1122 = vmatpush3.bf16.msra.mxu0 (%p239_p6), %v1253_v0  ;;  %v246_v4 = vld [vmem:[#allocation2] sm:$0xff] (%p239_p6)  ;;  %v1263_v8 = vld [vmem:[#allocation9 + $0x74] ss:$8 sps:$4 sm:$0xff] (%p239_p6)   ;;  %v1261_v10 = vld [vmem:[#allocation9 + $0x70] ss:$8 sps:$4 sm:$0xff] (%p239_p6)   ;;  %s2127_s0 = sand.u32 (%p239_p6), 1, %s1535_s25  }
  0x66   : > { %1123 = vmatprep.subr.bf16.mxu0 (%p239_p6), %v1254_v1  ;;  %v262_v6 = vpack.c.bf16 (%p239_p6), %v247_v5, %v246_v4  ;;  %v1258_v9 = vld [vmem:[#allocation6 + $0x10] sm:$0xff] (%p239_p6)   ;;  %v1266_v11 = vld [vmem:[#allocation9 + $0x64] ss:$8 sps:$4 sm:$0xff] (%p239_p6)   ;;  %1153 = vmatprep.subr.bf16.mxu1 (%p239_p6), %v1263_v8  ;;  %v1264_v13 = vld [vmem:[#allocation9 + $0x60] ss:$8 sps:$4 sm:$0xff] (%p239_p6)   ;;  %s2068_s7 = scalar_lea.sflag (%p239_p6), [#allocation8], %s2127_s0 }
  0x67   : > { %1161 = vmatpush1.bf16.msra.mxu1 (%p239_p6), %v1261_v10  ;;  %v1259_v12 = vld [vmem:[#allocation6 + $0x8] sm:$0xff] (%p239_p6)   ;;  %v1269_v14 = vld [vmem:[#allocation9 + $0x54] ss:$8 sps:$4 sm:$0xff] (%p239_p6)   ;;  %v1267_v15 = vld [vmem:[#allocation9 + $0x50] ss:$8 sps:$4 sm:$0xff] (%p239_p6)   ;;  %s1463_s11 = scalar_lea.vmem (%p239_p6), %s2060_s22, 4096 }
  0x68   : > { %1137 = vmatprep.mubr.bf16.mxu0 (%p239_p6), %v262_v6  ;;  %1154 = vmatprep.subr.bf16.mxu1 (%p239_p6), %v1266_v11  ;;  %v1260_v16 = vld [vmem:[#allocation6] sm:$0xff] (%p239_p6)   ;;  %v248_v18 = vld [vmem:[#allocation2 + $0x10] sm:$0xff] (%p239_p6)  ;;  %v249_v19 = vld [vmem:[#allocation2 + $0x18] sm:$0xff] (%p239_p6)  ;;  %p1464_p9 = scmp.ne.s32.totalorder (%p239_p6), %s2060_s22, %s1463_s11  ;;  %s1562_s16 = smov (%p239_p6), [#allocation11]  }
  0x69   : > { %1124 = vmatpush3.bf16.msra.mxu0 %v1254_v1  ;;  %v1272_v17 = vld [vmem:[#allocation9 + $0x44] ss:$8 sps:$4 sm:$0xff]   ;;  %v1270_v20 = vld [vmem:[#allocation9 + $0x40] ss:$8 sps:$4 sm:$0xff]   ;;  %v1275_v23 = vld [vmem:[#allocation9 + $0x34] ss:$8 sps:$4 sm:$0xff]   ;;  %v263_v24 = vpack.c.bf16 %v249_v19, %v248_v18 }
  0x6a   : > { %1125 = vmatprep.subr.bf16.mxu0 %v1255_v2  ;;  %v250_v21 = vld [vmem:[#allocation2 + $0x20] sm:$0xff]  ;;  %v251_v22 = vld [vmem:[#allocation2 + $0x28] sm:$0xff]  ;;  %v1273_v26 = vld [vmem:[#allocation9 + $0x30] ss:$8 sps:$4 sm:$0xff]   ;;  %p1465_p10 = pnand %p1464_p9, %p1641_p5  ;;  %s1467_s17 = sshll.u32 %s1562_s16, 4  ;;  %s1468_s17 = int_to_ptr.vmem [resolvable:$false] %s1467_s17 }
  0x6b   : > { %1162 = vmatpush1.bf16.msra.mxu1 %v1264_v13  ;;  %v264_v25 = vpack.c.bf16 %v251_v22, %v250_v21  ;;  %v252_v27 = vld [vmem:[#allocation2 + $0x30] sm:$0xff]  ;;  %v253_v28 = vld [vmem:[#allocation2 + $0x38] sm:$0xff]  ;;  %v254_v29 = vld [vmem:[#allocation2 + $0x40] sm:$0xff]  ;;  %s1469_s18 = scalar_lea.vmem %s1468_s17, 8192  ;;  %p1470_p7 = scmp.lt.s32.totalorder %s2060_s22, %s1468_s17 }
  0x6c   : > { %1155 = vmatprep.subr.bf16.mxu1 %v1269_v14  ;;  %v255_v30 = vld [vmem:[#allocation2 + $0x48] sm:$0xff]  ;;  %v265_v31 = vpack.c.bf16 %v253_v28, %v252_v27  ;;  %v256_v33 = vld [vmem:[#allocation2 + $0x50] sm:$0xff]  ;;  %v257_v34 = vld [vmem:[#allocation2 + $0x58] sm:$0xff]  ;;  %p1466_p12 = pneg %p1465_p10  ;;  %p1471_p8 = scmp.lt.s32.totalorder %s1469_s18, %s1463_s11 }
  0x6d   : > { %1126 = vmatpush3.bf16.msra.mxu0 %v1255_v2  ;;  %v266_v32 = vpack.c.bf16 %v255_v30, %v254_v29  ;;  %v258_v35 = vld [vmem:[#allocation2 + $0x60] sm:$0xff]  ;;  %v259_v36 = vld [vmem:[#allocation2 + $0x68] sm:$0xff]  ;;  %v267_v37 = vpack.c.bf16 %v257_v34, %v256_v33  ;;  %v260_v39 = vld [vmem:[#allocation2 + $0x70] sm:$0xff] }
  0x6e   : > { %1127 = vmatprep.subr.bf16.mxu0 %v1256_v3  ;;  %v268_v38 = vpack.c.bf16 %v259_v36, %v258_v35  ;;  %v261_v40 = vld [vmem:[#allocation2 + $0x78] sm:$0xff]  ;;  %v1278_v42 = vld [vmem:[#allocation9 + $0x24] ss:$8 sps:$4 sm:$0xff]   ;;  %v1276_v43 = vld [vmem:[#allocation9 + $0x20] ss:$8 sps:$4 sm:$0xff]   ;;  %p1472_p11 = por %p1471_p8, %p1470_p7 }
  0x6f   : > { %1163 = vmatpush1.bf16.msra.mxu1 %v1267_v15  ;;  %v269_v41 = vpack.c.bf16 %v261_v40, %v260_v39  ;;  %v1281_v44 = vld [vmem:[#allocation9 + $0x14] ss:$8 sps:$4 sm:$0xff]   ;;  %v1279_v45 = vld [vmem:[#allocation9 + $0x10] ss:$8 sps:$4 sm:$0xff]   ;;  %v1284_v46 = vld [vmem:[#allocation9 + $0x4] ss:$8 sps:$4 sm:$0xff]  }
  0x70   : > { %1156 = vmatprep.subr.bf16.mxu1 %v1272_v17  ;;  %v1282_v47 = vld [vmem:[#allocation9] ss:$8 sps:$4 sm:$0xff]   ;;  %p1473_p0 = pnand %p1472_p11, %p1466_p12 }
  0x71   : > { %1128 = vmatpush3.bf16.msra.mxu0 %v1256_v3  ;;  %v1071_v51 = vld [vmem:[%s2111_s3] ss:$0 sm:$0xff] }
  0x72   : > { %1129 = vmatprep.subr.bf16.mxu0 %v1257_v7 }
  0x73   : > { %1164 = vmatpush1.bf16.msra.mxu1 %v1270_v20 }
  0x74   : > { %1157 = vmatprep.subr.bf16.mxu1 %v1275_v23 }
  0x75   : > { %1130 = vmatpush3.bf16.msra.mxu0 %v1257_v7 }
  0x76   : > { %1131 = vmatprep.subr.bf16.mxu0 %v1258_v9 }
  0x77   : > { %1165 = vmatpush1.bf16.msra.mxu1 %v1273_v26 }
  0x78   : > { %1158 = vmatprep.subr.bf16.mxu1 %v1278_v42 }
  0x79   : > { %1132 = vmatpush3.bf16.msra.mxu0 %v1258_v9 }
  0x7a   : > { %1133 = vmatprep.subr.bf16.mxu0 %v1259_v12 }
  0x7b   : > { %1166 = vmatpush1.bf16.msra.mxu1 %v1276_v43 }
  0x7c   : > { %1159 = vmatprep.subr.bf16.mxu1 %v1281_v44 }
  0x7d   : > { %1134 = vmatpush3.bf16.msra.mxu0 %v1259_v12 }
  0x7e   : > { %1135 = vmatprep.subr.bf16.mxu0 %v1260_v16 }
  0x7f   : > { %1167 = vmatpush1.bf16.msra.mxu1 %v1279_v45 }
  0x80   : > { %1160 = vmatprep.subr.bf16.mxu1 %v1284_v46 }
  0x81   : > { %1136 = vmatpush3.bf16.msra.mxu0 %v1260_v16 }
  0x82   : > { %570 = vmatprep.subr.bf16.mxu0 %v1263_v8 }
  0x83   : > { %1168 = vmatpush1.bf16.msra.mxu1 %v1282_v47 }
  0x84   : > { %1138 = vmatmul.mubr.bf16.vlgmr.msra.gmra.mxu0 %v263_v24 }
  0x85   : > { %1141 = vmatprep.mubr.bf16.mxu0 %v264_v25  ;;  %571 = vmatpush1.bf16.msra.mxu0 %v1261_v10 }
  0x86   : > { %572 = vmatprep.subr.bf16.mxu0 %v1266_v11 }
  0x89   : > { %573 = vmatpush1.bf16.msra.mxu0 %v1264_v13 }
  0x8a   : > { %574 = vmatprep.subr.bf16.mxu0 %v1269_v14 }
  0x8c   : > { %1142 = vmatmul.mubr.bf16.gmra.mxu0 %v265_v31 }
  0x8d   : > { %1145 = vmatprep.mubr.bf16.mxu0 %v266_v32  ;;  %575 = vmatpush1.bf16.msra.mxu0 %v1267_v15 }
  0x8e   : > { %576 = vmatprep.subr.bf16.mxu0 %v1272_v17 }
  0x91   : > { %577 = vmatpush1.bf16.msra.mxu0 %v1270_v20 }
  0x92   : > { %578 = vmatprep.subr.bf16.mxu0 %v1275_v23 }
  0x94   : > { %1146 = vmatmul.mubr.bf16.gmra.mxu0 %v267_v37 }
  0x95   : > { %1149 = vmatprep.mubr.bf16.mxu0 %v268_v38  ;;  %579 = vmatpush1.bf16.msra.mxu0 %v1273_v26 }
  0x96   : > { %580 = vmatprep.subr.bf16.mxu0 %v1278_v42  ;;  %v480_v42 = vlaneseq }
  0x99   : > { %581 = vmatpush1.bf16.msra.mxu0 %v1276_v43  ;;  %v481_v43 = vshrl.u32 %v480_v42, 7 }
  0x9a   : > { %582 = vmatprep.subr.bf16.mxu0 %v1281_v44 }
  0x9b   : > { %v482_v44 = vsub.s32 0, %v481_v43 }
  0x9c   : > { %1150 = vmatmul.mubr.bf16.gmra.mxu0 %v269_v41 }
  0x9d   : > { %583 = vmatpush1.bf16.msra.mxu0 %v1279_v45  ;;  %602 = vmatprep.mubr.bf16.mxu0 %v1561_v48  ;;  %v486_v45 = vsub.s32 1, %v481_v43 }
  0x9e   : > { %584 = vmatprep.subr.bf16.mxu0 %v1284_v46  ;;  %v478_v46 = vld [vmem:[%s2113_s5] sm:$0x3] }
  0xa1   : > { %585 = vmatpush1.bf16.msra.mxu0 %v1282_v47  ;;  %v1733_v47 = vrot.slane %v478_v46, %v482_v44 }
 0x144   : > { %v1139_v49 = vpop.f32.mrf.mxu0 }
 0x145   : > { %v384_v63 = vadd.f32 %v1139_v49, %v1071_v51  ;;  %v1735_v49 = vrot.slane %v478_v46, %v486_v45 }
 0x146   : > { %v375_v50 = vpop.f32.mrf.mxu0 }
 0x147   : > { %v376_v53 = vadd.f32 %v1071_v51, %v375_v50  ;;  %v440_v5 = vmax.f32 %v384_v63, 0.0 }
 0x148   : > { %v1140_v52 = vpop.f32.mrf.mxu0 }
 0x149   : > { %v438_v57 = vmax.f32 %v376_v53, 0.0  ;;  %v387_v60 = vadd.f32 %v1140_v52, %v1071_v51 }
 0x14a   : > { %v378_v54 = vpop.f32.mrf.mxu0 }
 0x14b   : > { %v379_v55 = vadd.f32 %v1071_v51, %v378_v54  ;;  %v441_v2 = vmax.f32 %v387_v60, 0.0 }
 0x14c   : > { %v1143_v56 = vpop.f32.mrf.mxu0 }
 0x14d   : > { %v439_v58 = vmax.f32 %v379_v55, 0.0  ;;  %v455_v9 = vpack.c.bf16 %v441_v2, %v440_v5  ;;  %v400_v13 = vadd.f32 %v1143_v56, %v1071_v51 }
 0x14e   : > { %v391_v59 = vpop.f32.mrf.mxu0 }
 0x14f   : > { %v454_v61 = vpack.c.bf16 %v439_v58, %v438_v57  ;;  %v392_v0 = vadd.f32 %v1071_v51, %v391_v59  ;;  %v444_v16 = vmax.f32 %v400_v13, 0.0 }
 0x150   : > { %v1144_v62 = vpop.f32.mrf.mxu0 }
 0x151   : > { %603 = vmatmul.mubr.bf16.vlgmr.msra.gmra.mxu0 %v454_v61  ;;  %v442_v6 = vmax.f32 %v392_v0, 0.0  ;;  %v403_v10 = vadd.f32 %v1144_v62, %v1071_v51 }
 0x152   : > { %v394_v1 = vpop.f32.mrf.mxu0  ;;  %612 = vmatprep.mubr.bf16.mxu0 %v1561_v48 }
 0x153   : > { %v395_v3 = vadd.f32 %v1071_v51, %v394_v1  ;;  %v445_v14 = vmax.f32 %v403_v10, 0.0 }
 0x154   : > { %v1147_v4 = vpop.f32.mrf.mxu0 }
 0x155   : > { %v443_v7 = vmax.f32 %v395_v3, 0.0  ;;  %v457_v17 = vpack.c.bf16 %v445_v14, %v444_v16  ;;  %v416_v24 = vadd.f32 %v1147_v4, %v1071_v51 }
 0x156   : > { %v407_v8 = vpop.f32.mrf.mxu0 }
 0x157   : > { %v456_v11 = vpack.c.bf16 %v443_v7, %v442_v6  ;;  %v408_v18 = vadd.f32 %v1071_v51, %v407_v8  ;;  %v448_v28 = vmax.f32 %v416_v24, 0.0 }
 0x158   : > { %v1148_v12 = vpop.f32.mrf.mxu0 }
 0x159   : > { %613 = vmatmul.mubr.bf16.gmra.mxu0 %v455_v9  ;;  %623 = vmatmul.mubr.bf16.vlgmr.msra.gmra.mxu1 %v456_v11  ;;  %v446_v21 = vmax.f32 %v408_v18, 0.0  ;;  %v419_v25 = vadd.f32 %v1148_v12, %v1071_v51 }
 0x15a   : > { %632 = vmatprep.mubr.bf16.mxu1 %v1561_v48  ;;  %v410_v15 = vpop.f32.mrf.mxu0 }
 0x15b   : > { %v411_v19 = vadd.f32 %v1071_v51, %v410_v15  ;;  %v449_v29 = vmax.f32 %v419_v25, 0.0 }
 0x15c   : > { %v1151_v20 = vpop.f32.mrf.mxu0 }
 0x15d   : > { %v447_v22 = vmax.f32 %v411_v19, 0.0  ;;  %v459_v31 = vpack.c.bf16 %v449_v29, %v448_v28  ;;  %v432_v36 = vadd.f32 %v1151_v20, %v1071_v51 }
 0x15e   : > { %v423_v23 = vpop.f32.mrf.mxu0 }
 0x15f   : > { %v458_v26 = vpack.c.bf16 %v447_v22, %v446_v21  ;;  %v424_v32 = vadd.f32 %v1071_v51, %v423_v23  ;;  %v452_v39 = vmax.f32 %v432_v36, 0.0 }
 0x160   : > { %v1152_v27 = vpop.f32.mrf.mxu0 }
 0x161   : > { %633 = vmatmul.mubr.bf16.gmra.mxu1 %v457_v17  ;;  %v450_v34 = vmax.f32 %v424_v32, 0.0  ;;  %v435_v37 = vadd.f32 %v1152_v27, %v1071_v51 }
 0x162   : > { %642 = vmatprep.mubr.bf16.mxu1 %v1561_v48  ;;  %v426_v30 = vpop.f32.mrf.mxu0 }
 0x163   : > { %v427_v33 = vadd.f32 %v1071_v51, %v426_v30  ;;  %v453_v40 = vmax.f32 %v435_v37, 0.0 }
 0x165   : > { %v451_v35 = vmax.f32 %v427_v33, 0.0  ;;  %v461_v41 = vpack.c.bf16 %v453_v40, %v452_v39 }
 0x167   : > { %v460_v38 = vpack.c.bf16 %v451_v35, %v450_v34 }
 0x169   : > { %643 = vmatmul.mubr.bf16.gmra.mxu1 %v458_v26 }
 0x16a   : > { %652 = vmatprep.mubr.bf16.mxu1 %v1561_v48 }
 0x171   : > { %653 = vmatmul.mubr.bf16.gmra.mxu1 %v459_v31 }
 0x172   : > { %662 = vmatprep.mubr.bf16.mxu1 %v1561_v48 }
 0x179   : > { %663 = vmatmul.mubr.bf16.gmra.mxu1 %v460_v38 }
 0x17a   : > { %672 = vmatprep.mubr.bf16.mxu1 %v1561_v48 }
 0x181   : > { %673 = vmatmul.mubr.bf16.gmra.mxu1 %v461_v41 }
 0x211   : > { %v604_v50 = vpop.f32.mrf.mxu0 }
 0x212   : > { %v1738_v48 = vadd.f32 %v604_v50, %v1733_v47 }
 0x213   : > { %v606_v51 = vpop.f32.mrf.mxu0 }
 0x214   : > { %v1741_v52 = vadd.f32 %v606_v51, %v1735_v49 }
 0x215   : > { %v608_v53 = vpop.f32.mrf.mxu0 }
 0x216   : > { %v683_v54 = vmax.f32 %v1738_v48, %v1741_v52  ;;  %v1746_v56 = vadd.f32 %v608_v53, %v1733_v47 }
 0x217   : > { %v610_v55 = vpop.f32.mrf.mxu0 }
 0x218   : > { %v1749_v57 = vadd.f32 %v610_v55, %v1735_v49  ;;  %684 = vmax.xlane.f32.xlu0 %v683_v54 }
 0x219   : > { %v614_v58 = vpop.f32.mrf.mxu0  ;;  %v624_v59 = vpop.f32.mrf.mxu1 }
 0x21a   : > { %v686_v60 = vmax.f32 %v1746_v56, %v1749_v57  ;;  %v1754_v63 = vadd.f32 %v614_v58, %v1733_v47  ;;  %v1757_v0 = vadd.f32 %v624_v59, %v1733_v47 }
 0x21b   : > { %v616_v61 = vpop.f32.mrf.mxu0  ;;  %v626_v62 = vpop.f32.mrf.mxu1 }
 0x21c   : > { %v1760_v1 = vadd.f32 %v616_v61, %v1735_v49  ;;  %v1763_v2 = vadd.f32 %v626_v62, %v1735_v49  ;;  %687 = vmax.xlane.f32.xlu0 %v686_v60 }
 0x21d   : > { %v618_v3 = vpop.f32.mrf.mxu0  ;;  %v628_v4 = vpop.f32.mrf.mxu1 }
 0x21e   : > { %v689_v5 = vmax.f32 %v1754_v63, %v1760_v1  ;;  %v695_v6 = vmax.f32 %v1757_v0, %v1763_v2  ;;  %v1770_v9 = vadd.f32 %v618_v3, %v1733_v47  ;;  %v1781_v15 = vadd.f32 %v628_v4, %v1733_v47 }
 0x21f   : > { %v620_v7 = vpop.f32.mrf.mxu0  ;;  %v630_v8 = vpop.f32.mrf.mxu1 }
 0x220   : > { %v1773_v10 = vadd.f32 %v620_v7, %v1735_v49  ;;  %690 = vmax.xlane.f32.xlu1 %v689_v5  ;;  %696 = vmax.xlane.f32.xlu0 %v695_v6  ;;  %v1776_v12 = vadd.f32 %v630_v8, %v1735_v49 }
 0x221   : > { %v634_v11 = vpop.f32.mrf.mxu1 }
 0x222   : > { %v692_v13 = vmax.f32 %v1770_v9, %v1773_v10  ;;  %v1784_v16 = vadd.f32 %v634_v11, %v1733_v47  ;;  %v698_v19 = vmax.f32 %v1781_v15, %v1776_v12 }
 0x223   : > { %v636_v14 = vpop.f32.mrf.mxu1 }
 0x224   : > { %v1787_v17 = vadd.f32 %v636_v14, %v1735_v49  ;;  %693 = vmax.xlane.f32.xlu1 %v692_v13 }
 0x225   : > { %v638_v18 = vpop.f32.mrf.mxu1 }
 0x226   : > { %v701_v20 = vmax.f32 %v1784_v16, %v1787_v17  ;;  %v1794_v22 = vadd.f32 %v638_v18, %v1733_v47 }
 0x227   : > { %v640_v21 = vpop.f32.mrf.mxu1 }
 0x228   : > { %v1797_v23 = vadd.f32 %v640_v21, %v1735_v49  ;;  %699 = vmax.xlane.f32.xlu1 %v698_v19  ;;  %702 = vmax.xlane.f32.xlu0 %v701_v20 }
 0x229   : > { %v644_v24 = vpop.f32.mrf.mxu1 }
 0x22a   : > { %v704_v25 = vmax.f32 %v1794_v22, %v1797_v23  ;;  %v1802_v27 = vadd.f32 %v644_v24, %v1733_v47 }
 0x22b   : > { %v646_v26 = vpop.f32.mrf.mxu1 }
 0x22c   : > { %v1805_v28 = vadd.f32 %v646_v26, %v1735_v49  ;;  %705 = vmax.xlane.f32.xlu1 %v704_v25 }
 0x22d   : > { %v648_v29 = vpop.f32.mrf.mxu1 }
 0x22e   : > { %v707_v30 = vmax.f32 %v1802_v27, %v1805_v28  ;;  %v1810_v32 = vadd.f32 %v648_v29, %v1733_v47 }
 0x22f   : > { %v650_v31 = vpop.f32.mrf.mxu1 }
 0x230   : > { %v1813_v33 = vadd.f32 %v650_v31, %v1735_v49  ;;  %708 = vmax.xlane.f32.xlu0 %v707_v30 }
 0x231   : > { %v654_v34 = vpop.f32.mrf.mxu1 }
 0x232   : > { %v710_v35 = vmax.f32 %v1810_v32, %v1813_v33  ;;  %v1818_v37 = vadd.f32 %v654_v34, %v1733_v47 }
 0x233   : > { %v656_v36 = vpop.f32.mrf.mxu1 }
 0x234   : > { %v1821_v38 = vadd.f32 %v656_v36, %v1735_v49  ;;  %711 = vmax.xlane.f32.xlu1 %v710_v35 }
 0x235   : > { %v658_v39 = vpop.f32.mrf.mxu1 }
 0x236   : > { %v713_v40 = vmax.f32 %v1818_v37, %v1821_v38  ;;  %v1826_v42 = vadd.f32 %v658_v39, %v1733_v47 }
 0x237   : > { %v660_v41 = vpop.f32.mrf.mxu1 }
 0x238   : > { %v1829_v43 = vadd.f32 %v660_v41, %v1735_v49  ;;  %714 = vmax.xlane.f32.xlu0 %v713_v40 }
 0x239   : > { %v664_v44 = vpop.f32.mrf.mxu1 }
 0x23a   : > { %v716_v45 = vmax.f32 %v1826_v42, %v1829_v43  ;;  %v1834_v50 = vadd.f32 %v664_v44, %v1733_v47 }
 0x23b   : > { %v666_v46 = vpop.f32.mrf.mxu1 }
 0x23c   : > { %v1837_v51 = vadd.f32 %v666_v46, %v1735_v49  ;;  %717 = vmax.xlane.f32.xlu1 %v716_v45 }
 0x23d   : > { %v668_v53 = vpop.f32.mrf.mxu1 }
 0x23e   : > { %v719_v54 = vmax.f32 %v1834_v50, %v1837_v51  ;;  %v1842_v58 = vadd.f32 %v668_v53, %v1733_v47 }
 0x23f   : > { %v670_v55 = vpop.f32.mrf.mxu1 }
 0x240   : > { %v1845_v59 = vadd.f32 %v670_v55, %v1735_v49  ;;  %720 = vmax.xlane.f32.xlu0 %v719_v54 }
 0x241   : > { %v674_v60 = vpop.f32.mrf.mxu1 }
 0x242   : > { %v722_v61 = vmax.f32 %v1842_v58, %v1845_v59  ;;  %v1850_v3 = vadd.f32 %v674_v60, %v1733_v47 }
 0x243   : > { %v676_v62 = vpop.f32.mrf.mxu1 }
 0x244   : > { %v1853_v4 = vadd.f32 %v676_v62, %v1735_v49  ;;  %723 = vmax.xlane.f32.xlu1 %v722_v61 }
 0x245   : > { %v678_v5 = vpop.f32.mrf.mxu1 }
 0x246   : > { %v725_v6 = vmax.f32 %v1850_v3, %v1853_v4  ;;  %v1858_v8 = vadd.f32 %v678_v5, %v1733_v47 }
 0x247   : > { %v680_v7 = vpop.f32.mrf.mxu1 }
 0x248   : > { %v1861_v11 = vadd.f32 %v680_v7, %v1735_v49  ;;  %726 = vmax.xlane.f32.xlu0 %v725_v6 }
 0x24a   : > { %v728_v13 = vmax.f32 %v1858_v8, %v1861_v11 }
 0x24c   : > { %729 = vmax.xlane.f32.xlu1 %v728_v13 }
 0x2a1   : > { %v685_v14 = vpop.xlane.xlu0 %684 }
 0x2a2   : > { %v731_v18 = vsub.f32 %v1738_v48, %v685_v14  ;;  %v732_v19 = vsub.f32 %v1741_v52, %v685_v14 }
 0x2a4   : > { %v763_v20 = vmul.f32 1.442695, %v731_v18  ;;  %v765_v21 = vmul.f32 1.442695, %v732_v19 }
 0x2a5   : > { %v688_v24 = vpop.xlane.xlu0 %687 }
 0x2a6   : > { %1285 = vpow2.f32 %v763_v20  ;;  %v733_v47 = vsub.f32 %v1746_v56, %v688_v24  ;;  %v734_v25 = vsub.f32 %v1749_v57, %v688_v24 }
 0x2a7   : > { %1287 = vpow2.f32 %v765_v21 }
 0x2a8   : > { %v767_v49 = vmul.f32 1.442695, %v733_v47  ;;  %v769_v26 = vmul.f32 1.442695, %v734_v25 }
 0x2a9   : > { %v691_v29 = vpop.xlane.xlu1 %690  ;;  %v697_v30 = vpop.xlane.xlu0 %696 }
 0x2aa   : > { %1289 = vpow2.f32 %v767_v49  ;;  %v735_v31 = vsub.f32 %v1754_v63, %v691_v29  ;;  %v736_v48 = vsub.f32 %v1760_v1, %v691_v29  ;;  %v739_v52 = vsub.f32 %v1757_v0, %v697_v30 }
 0x2ab   : > { %1291 = vpow2.f32 %v769_v26  ;;  %v740_v34 = vsub.f32 %v1763_v2, %v697_v30 }
 0x2ac   : > { %v771_v35 = vmul.f32 1.442695, %v735_v31  ;;  %v773_v36 = vmul.f32 1.442695, %v736_v48  ;;  %v779_v56 = vmul.f32 1.442695, %v739_v52 }
 0x2ad   : > { %v781_v39 = vmul.f32 1.442695, %v740_v34  ;;  %v694_v57 = vpop.xlane.xlu1 %693 }
 0x2ae   : > { %1293 = vpow2.f32 %v771_v35  ;;  %v737_v40 = vsub.f32 %v1770_v9, %v694_v57  ;;  %v738_v41 = vsub.f32 %v1773_v10, %v694_v57 }
 0x2af   : > { %1295 = vpow2.f32 %v773_v36 }
 0x2b0   : > { %1297 = vpow2.f32 %v779_v56  ;;  %v775_v63 = vmul.f32 1.442695, %v737_v40  ;;  %v777_v44 = vmul.f32 1.442695, %v738_v41 }
 0x2b1   : > { %1299 = vpow2.f32 %v781_v39  ;;  %v700_v1 = vpop.xlane.xlu1 %699  ;;  %v703_v0 = vpop.xlane.xlu0 %702 }
 0x2b2   : > { %1301 = vpow2.f32 %v775_v63  ;;  %v741_v2 = vsub.f32 %v1781_v15, %v700_v1  ;;  %v742_v45 = vsub.f32 %v1776_v12, %v700_v1  ;;  %v743_v46 = vsub.f32 %v1784_v16, %v703_v0 }
 0x2b3   : > { %v1878_v53 = vpop.eup %1285  ;;  %1303 = vpow2.f32 %v777_v44  ;;  %v744_v9 = vsub.f32 %v1787_v17, %v703_v0 }
 0x2b4   : > { %v1881_v10 = vpop.eup %1287  ;;  %v783_v54 = vmul.f32 1.442695, %v741_v2  ;;  %v785_v55 = vmul.f32 1.442695, %v742_v45  ;;  %v787_v60 = vmul.f32 1.442695, %v743_v46 }
 0x2b5   : > { %v789_v61 = vmul.f32 1.442695, %v744_v9  ;;  %v706_v62 = vpop.xlane.xlu1 %705  ;;  %v827_v5 = vadd.f32 %v1881_v10, %v1878_v53 }
 0x2b6   : > { %1305 = vpow2.f32 %v783_v54  ;;  %v745_v12 = vsub.f32 %v1794_v22, %v706_v62  ;;  %v746_v15 = vsub.f32 %v1797_v23, %v706_v62 }
 0x2b7   : > { %v1887_v16 = vpop.eup %1289  ;;  %1307 = vpow2.f32 %v785_v55  ;;  %828 = vadd.xlane.f32.xlu0 %v827_v5 }
 0x2b8   : > { %v1889_v17 = vpop.eup %1291  ;;  %1309 = vpow2.f32 %v787_v60  ;;  %v791_v6 = vmul.f32 1.442695, %v745_v12  ;;  %v793_v7 = vmul.f32 1.442695, %v746_v15 }
 0x2b9   : > { %1311 = vpow2.f32 %v789_v61  ;;  %v709_v13 = vpop.xlane.xlu0 %708  ;;  %v830_v14 = vadd.f32 %v1889_v17, %v1887_v16 }
 0x2ba   : > { %1313 = vpow2.f32 %v791_v6  ;;  %v747_v18 = vsub.f32 %v1802_v27, %v709_v13  ;;  %v748_v22 = vsub.f32 %v1805_v28, %v709_v13 }
 0x2bb   : > { %v1895_v23 = vpop.eup %1293  ;;  %1315 = vpow2.f32 %v793_v7  ;;  %831 = vadd.xlane.f32.xlu1 %v830_v14 }
 0x2bc   : > { %v1897_v19 = vpop.eup %1295  ;;  %v795_v20 = vmul.f32 1.442695, %v747_v18  ;;  %v797_v21 = vmul.f32 1.442695, %v748_v22 }
 0x2bd   : > { %v1899_v24 = vpop.eup %1297  ;;  %v712_v47 = vpop.xlane.xlu1 %711  ;;  %v833_v25 = vadd.f32 %v1897_v19, %v1895_v23 }
 0x2be   : > { %v1903_v49 = vpop.eup %1299  ;;  %1317 = vpow2.f32 %v795_v20  ;;  %v749_v27 = vsub.f32 %v1810_v32, %v712_v47  ;;  %v750_v28 = vsub.f32 %v1813_v33, %v712_v47 }
 0x2bf   : > { %v1907_v26 = vpop.eup %1301  ;;  %1319 = vpow2.f32 %v797_v21  ;;  %834 = vadd.xlane.f32.xlu0 %v833_v25  ;;  %v839_v34 = vadd.f32 %v1903_v49, %v1899_v24 }
 0x2c0   : > { %v1909_v29 = vpop.eup %1303  ;;  %v799_v30 = vmul.f32 1.442695, %v749_v27  ;;  %v801_v31 = vmul.f32 1.442695, %v750_v28 }
 0x2c1   : > { %v715_v48 = vpop.xlane.xlu0 %714  ;;  %v836_v52 = vadd.f32 %v1909_v29, %v1907_v26 }
 0x2c2   : > { %1321 = vpow2.f32 %v799_v30  ;;  %v751_v32 = vsub.f32 %v1818_v37, %v715_v48  ;;  %v752_v33 = vsub.f32 %v1821_v38, %v715_v48 }
 0x2c3   : > { %v1917_v35 = vpop.eup %1305  ;;  %1323 = vpow2.f32 %v801_v31  ;;  %837 = vadd.xlane.f32.xlu1 %v836_v52  ;;  %840 = vadd.xlane.f32.xlu0 %v839_v34 }
 0x2c4   : > { %v1919_v36 = vpop.eup %1307  ;;  %v803_v56 = vmul.f32 1.442695, %v751_v32  ;;  %v805_v39 = vmul.f32 1.442695, %v752_v33 }
 0x2c5   : > { %v1921_v57 = vpop.eup %1309  ;;  %v718_v40 = vpop.xlane.xlu1 %717  ;;  %v842_v41 = vadd.f32 %v1919_v36, %v1917_v35 }
 0x2c6   : > { %v1925_v63 = vpop.eup %1311  ;;  %1325 = vpow2.f32 %v803_v56  ;;  %v753_v37 = vsub.f32 %v1826_v42, %v718_v40  ;;  %v754_v38 = vsub.f32 %v1829_v43, %v718_v40 }
 0x2c7   : > { %v1929_v44 = vpop.eup %1313  ;;  %1327 = vpow2.f32 %v805_v39  ;;  %843 = vadd.xlane.f32.xlu1 %v842_v41  ;;  %v845_v1 = vadd.f32 %v1925_v63, %v1921_v57 }
 0x2c8   : > { %v1933_v0 = vpop.eup %1315  ;;  %v807_v2 = vmul.f32 1.442695, %v753_v37  ;;  %v809_v45 = vmul.f32 1.442695, %v754_v38 }
 0x2c9   : > { %846 = vadd.xlane.f32.xlu0 %v845_v1  ;;  %v721_v46 = vpop.xlane.xlu0 %720  ;;  %v848_v9 = vadd.f32 %v1933_v0, %v1929_v44 }
 0x2ca   : > { %1329 = vpow2.f32 %v807_v2  ;;  %v755_v42 = vsub.f32 %v1834_v50, %v721_v46  ;;  %v756_v43 = vsub.f32 %v1837_v51, %v721_v46 }
 0x2cb   : > { %v1939_v54 = vpop.eup %1317  ;;  %1331 = vpow2.f32 %v809_v45  ;;  %849 = vadd.xlane.f32.xlu1 %v848_v9 }
 0x2cc   : > { %v1941_v55 = vpop.eup %1319  ;;  %v811_v60 = vmul.f32 1.442695, %v755_v42  ;;  %v813_v61 = vmul.f32 1.442695, %v756_v43 }
 0x2cd   : > { %v724_v62 = vpop.xlane.xlu1 %723  ;;  %v851_v5 = vadd.f32 %v1941_v55, %v1939_v54 }
 0x2ce   : > { %1333 = vpow2.f32 %v811_v60  ;;  %v757_v12 = vsub.f32 %v1842_v58, %v724_v62  ;;  %v758_v15 = vsub.f32 %v1845_v59, %v724_v62 }
 0x2cf   : > { %v1947_v50 = vpop.eup %1321  ;;  %1335 = vpow2.f32 %v813_v61  ;;  %852 = vadd.xlane.f32.xlu0 %v851_v5 }
 0x2d0   : > { %v1949_v51 = vpop.eup %1323  ;;  %v815_v6 = vmul.f32 1.442695, %v757_v12  ;;  %v817_v7 = vmul.f32 1.442695, %v758_v15 }
 0x2d1   : > { %v727_v13 = vpop.xlane.xlu0 %726  ;;  %v854_v14 = vadd.f32 %v1949_v51, %v1947_v50 }
 0x2d2   : > { %1337 = vpow2.f32 %v815_v6  ;;  %v759_v18 = vsub.f32 %v1850_v3, %v727_v13  ;;  %v760_v22 = vsub.f32 %v1853_v4, %v727_v13 }
 0x2d3   : > { %v1955_v58 = vpop.eup %1325  ;;  %1339 = vpow2.f32 %v817_v7  ;;  %855 = vadd.xlane.f32.xlu1 %v854_v14 }
 0x2d4   : > { %v1957_v59 = vpop.eup %1327  ;;  %v819_v20 = vmul.f32 1.442695, %v759_v18  ;;  %v821_v21 = vmul.f32 1.442695, %v760_v22 }
 0x2d5   : > { %v730_v47 = vpop.xlane.xlu1 %729  ;;  %v857_v25 = vadd.f32 %v1957_v59, %v1955_v58 }
 0x2d6   : > { %1341 = vpow2.f32 %v819_v20  ;;  %v761_v27 = vsub.f32 %v1858_v8, %v730_v47  ;;  %v762_v28 = vsub.f32 %v1861_v11, %v730_v47 }
 0x2d7   : > { %v1963_v3 = vpop.eup %1329  ;;  %1343 = vpow2.f32 %v821_v21  ;;  %858 = vadd.xlane.f32.xlu0 %v857_v25 }
 0x2d8   : > { %v1965_v4 = vpop.eup %1331  ;;  %v823_v30 = vmul.f32 1.442695, %v761_v27  ;;  %v825_v31 = vmul.f32 1.442695, %v762_v28 }
 0x2d9   : > { %v860_v48 = vadd.f32 %v1965_v4, %v1963_v3 }
 0x2da   : > { %1345 = vpow2.f32 %v823_v30 }
 0x2db   : > { %v1969_v52 = vpop.eup %1333  ;;  %1347 = vpow2.f32 %v825_v31  ;;  %861 = vadd.xlane.f32.xlu1 %v860_v48 }
 0x2dc   : > { %v1971_v34 = vpop.eup %1335 }
 0x2dd   : > { %v863_v8 = vadd.f32 %v1971_v34, %v1969_v52 }
 0x2df   : > { %v1975_v11 = vpop.eup %1337  ;;  %864 = vadd.xlane.f32.xlu0 %v863_v8 }
 0x2e0   : > { %v1977_v32 = vpop.eup %1339 }
 0x2e1   : > { %v866_v33 = vadd.f32 %v1977_v32, %v1975_v11 }
 0x2e3   : > { %v1981_v56 = vpop.eup %1341  ;;  %867 = vadd.xlane.f32.xlu1 %v866_v33 }
 0x2e4   : > { %v1983_v39 = vpop.eup %1343 }
 0x2e5   : > { %v869_v40 = vadd.f32 %v1983_v39, %v1981_v56 }
 0x2e7   : > { %v1987_v41 = vpop.eup %1345  ;;  %870 = vadd.xlane.f32.xlu0 %v869_v40 }
 0x2e8   : > { %v1989_v37 = vpop.eup %1347 }
 0x2e9   : > { %v872_v38 = vadd.f32 %v1989_v37, %v1987_v41 }
 0x2eb   : > { %873 = vadd.xlane.f32.xlu1 %v872_v38 }
 0x340   : > { %v829_v1 = vpop.xlane.xlu0 %828 }
 0x341   : > { %1349 = vrcp.f32 %v829_v1 }
 0x344   : > { %v832_v2 = vpop.xlane.xlu1 %831 }
 0x345   : > { %1351 = vrcp.f32 %v832_v2 }
 0x348   : > { %v835_v45 = vpop.xlane.xlu0 %834 }
 0x349   : > { %1353 = vrcp.f32 %v835_v45 }
 0x34c   : > { %v838_v46 = vpop.xlane.xlu1 %837  ;;  %v841_v9 = vpop.xlane.xlu0 %840 }
 0x34d   : > { %1355 = vrcp.f32 %v838_v46 }
 0x34e   : > { %v1350_v42 = vpop.eup %1349  ;;  %1357 = vrcp.f32 %v841_v9 }
 0x34f   : > { %v891_v43 = vmul.f32 %v1350_v42, %v1878_v53  ;;  %v892_v60 = vmul.f32 %v1350_v42, %v1881_v10 }
 0x350   : > { %v844_v61 = vpop.xlane.xlu1 %843 }
 0x351   : > { %923 = vst [vmem:[%s1696_s14] sm:$0xff] %v891_v43  ;;  %924 = vst [vmem:[%s1696_s14 + $0x8] sm:$0xff] %v892_v60  ;;  %1359 = vrcp.f32 %v844_v61 }
 0x352   : > { %v1352_v62 = vpop.eup %1351  ;;  %v847_v5 = vpop.xlane.xlu0 %846 }
 0x353   : > { %v893_v12 = vmul.f32 %v1352_v62, %v1887_v16  ;;  %v894_v15 = vmul.f32 %v1352_v62, %v1889_v17  ;;  %1361 = vrcp.f32 %v847_v5 }
 0x354   : > { %v850_v6 = vpop.xlane.xlu1 %849 }
 0x355   : > { %925 = vst [vmem:[%s1696_s14 + $0x10] sm:$0xff] %v893_v12  ;;  %926 = vst [vmem:[%s1696_s14 + $0x18] sm:$0xff] %v894_v15  ;;  %1363 = vrcp.f32 %v850_v6 }
 0x356   : > { %v1354_v53 = vpop.eup %1353 }
 0x357   : > { %v895_v10 = vmul.f32 %v1354_v53, %v1895_v23  ;;  %v896_v7 = vmul.f32 %v1354_v53, %v1897_v19 }
 0x358   : > { %v853_v13 = vpop.xlane.xlu0 %852 }
 0x359   : > { %927 = vst [vmem:[%s1696_s14 + $0x20] sm:$0xff] %v895_v10  ;;  %928 = vst [vmem:[%s1696_s14 + $0x28] sm:$0xff] %v896_v7  ;;  %1365 = vrcp.f32 %v853_v13 }
 0x35a   : > { %v1356_v16 = vpop.eup %1355 }
 0x35b   : > { %v1358_v17 = vpop.eup %1357  ;;  %v897_v14 = vmul.f32 %v1356_v16, %v1907_v26  ;;  %v898_v18 = vmul.f32 %v1356_v16, %v1909_v29 }
 0x35c   : > { %v899_v22 = vmul.f32 %v1358_v17, %v1899_v24  ;;  %v900_v23 = vmul.f32 %v1358_v17, %v1903_v49  ;;  %v856_v20 = vpop.xlane.xlu1 %855 }
 0x35d   : > { %929 = vst [vmem:[%s1696_s14 + $0x30] sm:$0xff] %v897_v14  ;;  %930 = vst [vmem:[%s1696_s14 + $0x38] sm:$0xff] %v898_v18  ;;  %1367 = vrcp.f32 %v856_v20 }
 0x35e   : > { %v1360_v19 = vpop.eup %1359  ;;  %931 = vst [vmem:[%s1696_s14 + $0x40] sm:$0xff] %v899_v22  ;;  %932 = vst [vmem:[%s1696_s14 + $0x48] sm:$0xff] %v900_v23 }
 0x35f   : > { %v901_v21 = vmul.f32 %v1360_v19, %v1917_v35  ;;  %v902_v26 = vmul.f32 %v1360_v19, %v1919_v36 }
 0x360   : > { %v1362_v29 = vpop.eup %1361  ;;  %v859_v47 = vpop.xlane.xlu0 %858 }
 0x361   : > { %933 = vst [vmem:[%s1696_s14 + $0x50] sm:$0xff] %v901_v21  ;;  %934 = vst [vmem:[%s1696_s14 + $0x58] sm:$0xff] %v902_v26  ;;  %v903_v24 = vmul.f32 %v1362_v29, %v1921_v57  ;;  %v904_v49 = vmul.f32 %v1362_v29, %v1925_v63  ;;  %1369 = vrcp.f32 %v859_v47 }
 0x362   : > { %v1364_v25 = vpop.eup %1363 }
 0x363   : > { %935 = vst [vmem:[%s1696_s14 + $0x60] sm:$0xff] %v903_v24  ;;  %936 = vst [vmem:[%s1696_s14 + $0x68] sm:$0xff] %v904_v49  ;;  %v905_v27 = vmul.f32 %v1364_v25, %v1929_v44  ;;  %v906_v35 = vmul.f32 %v1364_v25, %v1933_v0 }
 0x364   : > { %v862_v36 = vpop.xlane.xlu1 %861 }
 0x365   : > { %937 = vst [vmem:[%s1696_s14 + $0x70] sm:$0xff] %v905_v27  ;;  %938 = vst [vmem:[%s1696_s14 + $0x78] sm:$0xff] %v906_v35  ;;  %1371 = vrcp.f32 %v862_v36 }
 0x366   : > { %v1366_v28 = vpop.eup %1365 }
 0x367   : > { %v907_v57 = vmul.f32 %v1366_v28, %v1939_v54  ;;  %v908_v63 = vmul.f32 %v1366_v28, %v1941_v55 }
 0x368   : > { %v865_v30 = vpop.xlane.xlu0 %864 }
 0x369   : > { %939 = vst [vmem:[%s1696_s14 + $0x80] sm:$0xff] %v907_v57  ;;  %940 = vst [vmem:[%s1696_s14 + $0x88] sm:$0xff] %v908_v63  ;;  %1373 = vrcp.f32 %v865_v30 }
 0x36a   : > { %v1368_v44 = vpop.eup %1367 }
 0x36b   : > { %v909_v0 = vmul.f32 %v1368_v44, %v1947_v50  ;;  %v910_v31 = vmul.f32 %v1368_v44, %v1949_v51 }
 0x36c   : > { %v868_v48 = vpop.xlane.xlu1 %867 }
 0x36d   : > { %941 = vst [vmem:[%s1696_s14 + $0x90] sm:$0xff] %v909_v0  ;;  %942 = vst [vmem:[%s1696_s14 + $0x98] sm:$0xff] %v910_v31  ;;  %1375 = vrcp.f32 %v868_v48 }
 0x36e   : > { %v1370_v54 = vpop.eup %1369 }
 0x36f   : > { %v911_v55 = vmul.f32 %v1370_v54, %v1955_v58  ;;  %v912_v8 = vmul.f32 %v1370_v54, %v1957_v59 }
 0x370   : > { %v871_v33 = vpop.xlane.xlu0 %870 }
 0x371   : > { %943 = vst [vmem:[%s1696_s14 + $0xa0] sm:$0xff] %v911_v55  ;;  %944 = vst [vmem:[%s1696_s14 + $0xa8] sm:$0xff] %v912_v8  ;;  %1377 = vrcp.f32 %v871_v33 }
 0x372   : > { %v1372_v50 = vpop.eup %1371 }
 0x373   : > { %v913_v51 = vmul.f32 %v1372_v50, %v1963_v3  ;;  %v914_v40 = vmul.f32 %v1372_v50, %v1965_v4 }
 0x374   : > { %v874_v38 = vpop.xlane.xlu1 %873 }
 0x375   : > { %945 = vst [vmem:[%s1696_s14 + $0xb0] sm:$0xff] %v913_v51  ;;  %946 = vst [vmem:[%s1696_s14 + $0xb8] sm:$0xff] %v914_v40  ;;  %1379 = vrcp.f32 %v874_v38 }
 0x376   : > { %v1374_v58 = vpop.eup %1373 }
 0x377   : > { %v915_v59 = vmul.f32 %v1374_v58, %v1969_v52  ;;  %v916_v1 = vmul.f32 %v1374_v58, %v1971_v34 }
 0x379   : > { %947 = vst [vmem:[%s1696_s14 + $0xc0] sm:$0xff] %v915_v59  ;;  %948 = vst [vmem:[%s1696_s14 + $0xc8] sm:$0xff] %v916_v1 }
 0x37a   : > { %v1376_v2 = vpop.eup %1375 }
 0x37b   : > { %v917_v3 = vmul.f32 %v1376_v2, %v1975_v11  ;;  %v918_v4 = vmul.f32 %v1376_v2, %v1977_v32 }
 0x37d   : > { %949 = vst [vmem:[%s1696_s14 + $0xd0] sm:$0xff] %v917_v3  ;;  %950 = vst [vmem:[%s1696_s14 + $0xd8] sm:$0xff] %v918_v4 }
 0x37e   : > { %v1378_v45 = vpop.eup %1377 }
 0x37f   : > { %v919_v46 = vmul.f32 %v1378_v45, %v1981_v56  ;;  %v920_v52 = vmul.f32 %v1378_v45, %v1983_v39 }
 0x381   : > { %951 = vst [vmem:[%s1696_s14 + $0xe0] sm:$0xff] %v919_v46  ;;  %952 = vst [vmem:[%s1696_s14 + $0xe8] sm:$0xff] %v920_v52 }
 0x382   : > { %v1380_v34 = vpop.eup %1379 }
 0x383   : > { %v921_v11 = vmul.f32 %v1380_v34, %v1987_v41  ;;  %v922_v32 = vmul.f32 %v1380_v34, %v1989_v37 }
 0x385   : > { %953 = vst [vmem:[%s1696_s14 + $0xf0] sm:$0xff] %v921_v11  ;;  %954 = vst [vmem:[%s1696_s14 + $0xf8] sm:$0xff] %v922_v32 }
 0x386   : > { %1476 = shalt.err (!%p1473_p0)
}
 0x387   : > { %s1477_s14 = scalar_lea.hbm %s2058_s30, 4096  ;;  %s1481_s12 = scalar_lea.hbm %s2114_s6, 8192 }
 0x388   : > { %p1478_p1 = scmp.ne.s32.totalorder %s2058_s30, %s1477_s14  ;;  %p1482_p4 = scmp.lt.s32.totalorder %s2058_s30, %s2114_s6 }
 0x389   : > { %p1483_p13 = scmp.lt.s32.totalorder %s1481_s12, %s1477_s14 }
 0x38a   : > { %p1479_p3 = pnand %p1478_p1, %p1641_p5 }
 0x38b   : > { %p1484_p6 = por %p1483_p13, %p1482_p4 }
 0x38c   : > { %p1480_p2 = pneg %p1479_p3 }
 0x38e   : > { %p1485_p9 = pnand %p1484_p6, %p1480_p2 }
 0x390   : > { %1488 = shalt.err (!%p1485_p9)
}
 0x391   : > { %s1563_s19 = smov 256   ;;  %s1564_s21 = smov 16  }
 0x392   : > { %1177 = dma.vmem_to_hbm [thread:$0]  (%p1641_p5), %s2060_s22, 4096, %s2058_s30, %s2068_s7, %s1563_s19, %s1563_s19, %s1564_s21  }
 0x393 PF: > { %p1194_p10 = scmp.ge.s32.totalorder %s1543_s27, 2  ;;  %s985_s23 = sand.u32 1, %s1531_s24  }
 0x394   : > { %p2128_p12 = scmp.ne.s32.totalorder %s2119_s10, 0  ;;  %s986_s28 = scalar_lea.sflag [#allocation8], %s985_s23 }
 0x396   : > { %p1187_p7 = pnand %p1194_p10, %p2128_p12 }
 0x398   : > { %p1188_p8 = pneg %p1187_p7 }
 0x39a   : > { %1526 = dma.done.wait (%p1188_p8), %s986_s28, 4096  }
 0x39b   : > { %1528 = vsyncadd (%p1188_p8), %s986_s28, 4294963200  ;;  %p22_p11 = scmp.ge.s32.totalorder %s1628_s29, 4   ;;  %s2129_s24 = smov %s1535_s25 }
 0x39c   : > { %s2130_s25 = smov %s1539_s26  ;;  %s2131_s26 = smov %s1639_s8 }
 0x39d   : > { %s2132_s27 = smov %s1628_s29  ;;  %24 = sbr.rel (!%p22_p11) target bundleno = 11 (0xb), region = 119 }
 0x3a2   :  { %991 = vsyncpa [#allocation7], 1 }
 0x3a3   :  { %993 = vsyncpa [#allocation7 + $0x1], 1 }
 0x3a4   :  { %994 = vsyncpa [#allocation10], 1 }
 0x3a5   :  { %995 = vsyncpa [#allocation8], 1 }
 0x3a6   :  { %997 = vsyncpa [#allocation8 + $0x1], 1 }
 0x3a7   :  { %998 = vsyncmov [#allocation3] }
 0x3aa   :  { %s999_s27 = vpop.sfrf %998 }
 0x3ab   :  { %p1102_p5 = scmp.ne.s32.totalorder %s999_s27, 0 }
 0x3ad   :  { %1003 = shalt.err (%p1102_p5)  }

</bundles_post_ra>
